<compile_context>
chip_gen: v7x
topology: tpu7x:2x2x1
jax: 0.10.0
libtpu: 0.0.40
codegen_flags: <defaults>
</compile_context>

<pallas_src>
import math
from typing import NamedTuple

import jax
import jax.numpy as jnp
from jax.experimental import pallas as pl
from jax.experimental.pallas import tpu as pltpu


_C = 256            # interleaved lane width per row: 128 (loc, scale) pairs
_HALF = 128         # lanes per output row
_SUBLANE = 8
_TARGET_IN_BLOCK_BYTES = 2 * 1024 * 1024


def _round_up(x: int, m: int) -> int:
    return ((x + m - 1) // m) * m


def _choose_tiling(rows: int, itemsize: int):
    """Balanced, 8-aligned row tiling with ~2 MiB input blocks."""
    max_rows = max(
        _SUBLANE,
        (_TARGET_IN_BLOCK_BYTES // (_C * itemsize)) // _SUBLANE * _SUBLANE,
    )
    n_blocks = pl.cdiv(rows, max_rows)
    # Medium inputs: force >= 2 (balanced) blocks so both v7x TensorCores get
    # equal work.  Costs one ~0.35 us extra grid step on single-core v5e/v6e.
    if n_blocks == 1 and rows >= 2 * _SUBLANE and rows * _C * itemsize >= (1 << 20):
        n_blocks = 2
    if n_blocks == 1:
        return rows, 1                       # single block (may be < 8 rows)
    tile_r = _round_up(pl.cdiv(rows, n_blocks), _SUBLANE)
    n_blocks = pl.cdiv(rows, tile_r)
    return tile_r, n_blocks


def _make_kernel(n_terms: int):
    """n_terms: exact bf16 decomposition terms (1 for bf16, 2 for f16, 3 for f32)."""

    def kernel(x_ref, perm_ref, loc_ref, scale_ref):
        perm = perm_ref[...]                 # (C, C) bf16 0/1 de-interleave matrix
        x = x_ref[...]                       # (tile_r, C) interleaved [loc, scale]

        if n_terms == 1:
            # bf16 * {0,1} with f32 accumulation is exact.
            y = jnp.dot(x.astype(jnp.bfloat16), perm,
                        preferred_element_type=jnp.float32)
        else:
            # Exact multi-term bf16 split of the f32 (or f16) input; every MXU
            # pass is exact (0/1 weights), the f32 re-sum reconstructs x.
            res = x.astype(jnp.float32)
            y = None
            for t in range(n_terms):
                c = res.astype(jnp.bfloat16)
                part = jnp.dot(c, perm, preferred_element_type=jnp.float32)
                y = part if y is None else y + part
                if t + 1 < n_terms:
                    res = res - c.astype(jnp.float32)

        loc = y[:, :_HALF]                   # pure copy of the loc channel
        s = y[:, _HALF:]                     # scale channel, f32
        # Numerically stable softplus + 0.001, computed only on the scale half.
        scale = jnp.maximum(s, 0.0) + jnp.log1p(jnp.exp(-jnp.abs(s))) + 0.001

        loc_ref[...] = loc.astype(loc_ref.dtype)
        scale_ref[...] = scale.astype(scale_ref.dtype)

    return kernel


class NormalParams(NamedTuple):
    """Stand-in for torch.distributions.Normal (loc, scale)."""
    loc: jax.Array
    scale: jax.Array


@jax.jit
def normal_distribution_layer(hidden_representation: jax.Array) -> NormalParams:
    if hidden_representation.shape[-1] != 2:
        raise ValueError("last dim must hold (loc, scale)")
    lead_shape = hidden_representation.shape[:-1]
    dtype = hidden_representation.dtype
    itemsize = jnp.dtype(dtype).itemsize

    n_pairs = math.prod(lead_shape)           # number of (loc, scale) pairs
    rows = pl.cdiv(n_pairs, _HALF)            # 128 pairs (= 256 elements) per row
    padded_pairs = rows * _HALF

    x_flat = hidden_representation.reshape(-1)          # free contiguous reshape
    if padded_pairs != n_pairs:
        # Fallback (one extra XLA pass) for pair counts not multiple of 128.
        x_flat = jnp.pad(x_flat, (0, 2 * (padded_pairs - n_pairs)))
    x2d = x_flat.reshape(rows, _C)                       # free contiguous reshape

    tile_r, n_blocks = _choose_tiling(rows, itemsize)

    if dtype == jnp.bfloat16:
        n_terms = 1
    elif dtype == jnp.float16:
        n_terms = 2
    else:
        n_terms = 3

    # Constant de-interleave permutation: y = x @ perm places the 128 loc lanes
    # first and the 128 scale lanes last.  0/1 entries in bf16 -> exact MXU math.
    col = jnp.arange(_C, dtype=jnp.int32)
    src = jnp.where(col < _HALF, 2 * col, 2 * (col - _HALF) + 1)
    perm = (jnp.arange(_C, dtype=jnp.int32)[:, None] == src[None, :]).astype(jnp.bfloat16)

    loc2d, scale2d = pl.pallas_call(
        _make_kernel(n_terms),
        out_shape=(jax.ShapeDtypeStruct((rows, _HALF), dtype),
                   jax.ShapeDtypeStruct((rows, _HALF), dtype)),
        grid=(n_blocks,),
        in_specs=[
            pl.BlockSpec((tile_r, _C), lambda i: (i, 0)),
            pl.BlockSpec((_C, _C), lambda i: (0, 0)),     # resident constant block
        ],
        out_specs=(
            pl.BlockSpec((tile_r, _HALF), lambda i: (i, 0)),
            pl.BlockSpec((tile_r, _HALF), lambda i: (i, 0)),
        ),
        compiler_params=pltpu.CompilerParams(
            dimension_semantics=("parallel",),
            vmem_limit_bytes=32 * 1024 * 1024,
        ),
    )(x2d, perm)

    loc_flat = loc2d.reshape(-1)
    scale_flat = scale2d.reshape(-1)
    if padded_pairs != n_pairs:
        loc_flat = loc_flat[:n_pairs]
        scale_flat = scale_flat[:n_pairs]
    return NormalParams(loc=loc_flat.reshape(lead_shape),
                        scale=scale_flat.reshape(lead_shape))


def _check(x):
    out = normal_distribution_layer(x)
    jax.block_until_ready(out.loc)
    jax.block_until_ready(out.scale)
    ref_loc = x[..., 0]
    ref_scale = jax.nn.softplus(x[..., 1].astype(jnp.float32)).astype(x.dtype) + 0.001
    assert out.loc.shape == ref_loc.shape and out.scale.shape == ref_scale.shape
    assert jnp.allclose(out.loc, ref_loc, rtol=1e-6, atol=1e-7), "loc mismatch"
    assert jnp.allclose(out.scale, ref_scale, rtol=1e-5, atol=1e-6), "scale mismatch"


if __name__ == "__main__":
    key = jax.random.PRNGKey(0)
    k0, k1, k2 = jax.random.split(key, 3)

    # Small shape from the module's forward: (batch=2, h=8, w=16, params=2).
    x_small = jax.random.normal(k0, (2, 8, 16, 2), dtype=jnp.float32)
    _check(x_small)

    # Larger shape exercising the multi-block, megacore-balanced path (grid = 2).
    x_big = jax.random.normal(k1, (4, 64, 512, 2), dtype=jnp.float32)
    _check(x_big)

    # Odd pair count exercising the pad fallback path.
    x_odd = jax.random.normal(k2, (3, 5, 7, 2), dtype=jnp.float32)
    _check(x_odd)

    print("KERNEL_OK")
</pallas_src>

<mosaic_0001>
module attributes {stable_mosaic.version = 11 : i64} {
  func.func @kernel(%arg0: i32, %arg1: memref<2x256xf32, #tpu.memory_space<vmem>>, %arg2: memref<256x256xbf16, #tpu.memory_space<vmem>>, %arg3: memref<2x128xf32, #tpu.memory_space<vmem>>, %arg4: memref<2x128xf32, #tpu.memory_space<vmem>>) attributes {dimension_semantics = [#tpu.dimension_semantics<parallel>], iteration_bounds = array<i64: 1>, scalar_prefetch = 0 : i64, scratch_operands = 0 : i64, tpu.core_type = #tpu.core_type<tc>, window_params = [{transform_indices = @transform_0, window_bounds = array<i64: 2, 256>}, {pipeline_mode = #tpu.pipeline_mode<synchronous>, transform_indices = @transform_1, window_bounds = array<i64: 256, 256>}, {transform_indices = @transform_2, window_bounds = array<i64: 2, 128>}, {transform_indices = @transform_3, window_bounds = array<i64: 2, 128>}]} {
    %c0 = arith.constant 0 : index
    %c0_0 = arith.constant 0 : index
    %0 = vector.load %arg2[%c0, %c0_0] : memref<256x256xbf16, #tpu.memory_space<vmem>>, vector<256x256xbf16>
    %c0_1 = arith.constant 0 : index
    %c0_2 = arith.constant 0 : index
    %1 = vector.load %arg1[%c0_1, %c0_2] : memref<2x256xf32, #tpu.memory_space<vmem>>, vector<2x256xf32>
    %2 = arith.truncf %1 : vector<2x256xf32> to vector<2x256xbf16>
    %cst = arith.constant dense<0.000000e+00> : vector<2x256xf32>
    %3 = tpu.matmul %2, %0, %cst {dimension_numbers = #tpu.dot_dimension_numbers<[1], [0], [0], [1], [0, 0, 1, 1], [], []>} : vector<2x256xbf16>, vector<256x256xbf16>, vector<2x256xf32> -> vector<2x256xf32>
    %4 = arith.extf %2 : vector<2x256xbf16> to vector<2x256xf32>
    %5 = arith.subf %1, %4 : vector<2x256xf32>
    %6 = arith.truncf %5 : vector<2x256xf32> to vector<2x256xbf16>
    %cst_3 = arith.constant dense<0.000000e+00> : vector<2x256xf32>
    %7 = tpu.matmul %6, %0, %cst_3 {dimension_numbers = #tpu.dot_dimension_numbers<[1], [0], [0], [1], [0, 0, 1, 1], [], []>} : vector<2x256xbf16>, vector<256x256xbf16>, vector<2x256xf32> -> vector<2x256xf32>
    %8 = arith.addf %3, %7 : vector<2x256xf32>
    %9 = arith.extf %6 : vector<2x256xbf16> to vector<2x256xf32>
    %10 = arith.subf %5, %9 : vector<2x256xf32>
    %11 = arith.truncf %10 : vector<2x256xf32> to vector<2x256xbf16>
    %cst_4 = arith.constant dense<0.000000e+00> : vector<2x256xf32>
    %12 = tpu.matmul %11, %0, %cst_4 {dimension_numbers = #tpu.dot_dimension_numbers<[1], [0], [0], [1], [0, 0, 1, 1], [], []>} : vector<2x256xbf16>, vector<256x256xbf16>, vector<2x256xf32> -> vector<2x256xf32>
    %13 = arith.addf %8, %12 : vector<2x256xf32>
    %14 = vector.extract_strided_slice %13 {offsets = [0, 0], sizes = [2, 128], strides = [1, 1]} : vector<2x256xf32> to vector<2x128xf32>
    %15 = vector.extract_strided_slice %13 {offsets = [0, 128], sizes = [2, 128], strides = [1, 1]} : vector<2x256xf32> to vector<2x128xf32>
    %cst_5 = arith.constant 0.000000e+00 : f32
    %16 = vector.broadcast %cst_5 : f32 to vector<2x128xf32>
    %17 = arith.maximumf %15, %16 : vector<2x128xf32>
    %18 = math.absf %15 : vector<2x128xf32>
    %cst_6 = arith.constant 0.000000e+00 : f32
    %19 = vector.broadcast %cst_6 : f32 to vector<2x128xf32>
    %20 = arith.subf %19, %18 : vector<2x128xf32>
    %21 = math.exp %20 : vector<2x128xf32>
    %22 = math.log1p %21 : vector<2x128xf32>
    %23 = arith.addf %17, %22 : vector<2x128xf32>
    %cst_7 = arith.constant 1.000000e-03 : f32
    %24 = vector.broadcast %cst_7 : f32 to vector<2x128xf32>
    %25 = arith.addf %23, %24 : vector<2x128xf32>
    %c0_8 = arith.constant 0 : index
    %c0_9 = arith.constant 0 : index
    %26 = vector.load %arg3[%c0_8, %c0_9] : memref<2x128xf32, #tpu.memory_space<vmem>>, vector<2x128xf32>
    tpu.vector_store %arg3[%c0_8, %c0_9], %14 {strides = array<i32>} : memref<2x128xf32, #tpu.memory_space<vmem>>, vector<2x128xf32>,
    %c0_10 = arith.constant 0 : index
    %c0_11 = arith.constant 0 : index
    %27 = vector.load %arg4[%c0_10, %c0_11] : memref<2x128xf32, #tpu.memory_space<vmem>>, vector<2x128xf32>
    tpu.vector_store %arg4[%c0_10, %c0_11], %25 {strides = array<i32>} : memref<2x128xf32, #tpu.memory_space<vmem>>, vector<2x128xf32>,
    return
  }
  func.func @transform_0(%arg0: i32) -> (i32, i32) {
    %c0_i32 = arith.constant 0 : i32
    %c0_i32_0 = arith.constant 0 : i32
    return %arg0, %c0_i32 : i32, i32
  }
  func.func @transform_1(%arg0: i32) -> (i32, i32) {
    %c0_i32 = arith.constant 0 : i32
    %c0_i32_0 = arith.constant 0 : i32
    %c0_i32_1 = arith.constant 0 : i32
    return %c0_i32, %c0_i32_0 : i32, i32
  }
  func.func @transform_2(%arg0: i32) -> (i32, i32) {
    %c0_i32 = arith.constant 0 : i32
    %c0_i32_0 = arith.constant 0 : i32
    return %arg0, %c0_i32 : i32, i32
  }
  func.func @transform_3(%arg0: i32) -> (i32, i32) {
    %c0_i32 = arith.constant 0 : i32
    %c0_i32_0 = arith.constant 0 : i32
    return %arg0, %c0_i32 : i32, i32
  }
}

</mosaic_0001>

<bundles_post_ra>
// kernel: normal_distribution_layer.1
= control target key start
LH: loop header
LB: loop body
LE: loop exit
PB: predicated region body
PF: predicated region fallthrough
CT: control target
= control target key end

     0   :  { %v515_v7 = vmov 1983009808   ;;  %v50_v9 = vlaneseq  ;;  %s767_s1 = inlined_call_operand.vmem [shape: bf16[256,256], index: 1, kind: input, shape index: {}]   ;;  %s768_s0 = inlined_call_operand.vmem [shape: f32[2,256], index: 0, kind: input, shape index: {}]   ;;  %s769_s2 = inlined_call_operand.vmem [shape: f32[2,128], index: 2, kind: output, shape index: {0}]   ;;  %s770_s3 = inlined_call_operand.vmem [shape: f32[2,128], index: 3, kind: output, shape index: {1}]  }
   0x1   :  { %v539_v0 = vld [vmem:[%s767_s1 + $0x4] ss:$8 sps:$4 sm:$0xff]   ;;  %v544_v1 = vld [vmem:[%s767_s1] ss:$8 sps:$4 sm:$0xff]   ;;  %v550_v2 = vld [vmem:[%s767_s1 + $0x14] ss:$8 sps:$4 sm:$0xff]   ;;  %v48_v8 = vunpack.c.l.s4 %v515_v7 }
   0x2   :  { %287 = vmatprep.subr.bf16.mxu0 %v539_v0  ;;  %246 = vmatprep.subr.bf16.mxu1 %v539_v0  ;;  %v557_v3 = vld [vmem:[%s767_s1 + $0x10] ss:$8 sps:$4 sm:$0xff]   ;;  %v564_v4 = vld [vmem:[%s767_s1 + $0x24] ss:$8 sps:$4 sm:$0xff]   ;;  %v571_v5 = vld [vmem:[%s767_s1 + $0x20] ss:$8 sps:$4 sm:$0xff]  }
   0x3   :  { %288 = vmatpush1.bf16.msra.mxu0 %v544_v1  ;;  %247 = vmatpush1.bf16.msra.mxu1 %v544_v1  ;;  %v578_v6 = vld [vmem:[%s767_s1 + $0x34] ss:$8 sps:$4 sm:$0xff]   ;;  %v585_v10 = vld [vmem:[%s767_s1 + $0x30] ss:$8 sps:$4 sm:$0xff]   ;;  %v592_v11 = vld [vmem:[%s767_s1 + $0x44] ss:$8 sps:$4 sm:$0xff]   ;;  %v49_v12 = vunpack.c.0.s8 %v48_v8 }
   0x4   :  { %289 = vmatprep.subr.bf16.mxu0 %v550_v2  ;;  %248 = vmatprep.subr.bf16.mxu1 %v550_v2  ;;  %v51_v13 = vshrl.u32 %v50_v9, 7  ;;  %v599_v14 = vld [vmem:[%s767_s1 + $0x40] ss:$8 sps:$4 sm:$0xff]   ;;  %v606_v15 = vld [vmem:[%s767_s1 + $0x54] ss:$8 sps:$4 sm:$0xff]  }
   0x5   :  { %v615_v17 = vld [vmem:[%s767_s1 + $0x50] ss:$8 sps:$4 sm:$0xff]   ;;  %v622_v18 = vld [vmem:[%s767_s1 + $0x64] ss:$8 sps:$4 sm:$0xff]   ;;  %v45_v19 = vld [vmem:[%s768_s0] sm:$0xf] }
   0x6   :  { %v609_v16 = vsub.s32 %v49_v12, %v51_v13  ;;  %v633_v21 = vld [vmem:[%s767_s1 + $0x60] ss:$8 sps:$4 sm:$0xff]   ;;  %v640_v22 = vld [vmem:[%s767_s1 + $0x74] ss:$8 sps:$4 sm:$0xff]   ;;  %v650_v27 = vld [vmem:[%s767_s1 + $0x70] ss:$8 sps:$4 sm:$0xff]  }
   0x7   :  { %290 = vmatpush1.bf16.msra.mxu0 %v557_v3  ;;  %249 = vmatpush1.bf16.msra.mxu1 %v557_v3  ;;  %v657_v28 = vld [vmem:[%s767_s1 + $0x84] ss:$8 sps:$4 sm:$0xff]   ;;  %v664_v31 = vld [vmem:[%s767_s1 + $0x80] ss:$8 sps:$4 sm:$0xff]   ;;  %v671_v32 = vld [vmem:[%s767_s1 + $0x94] ss:$8 sps:$4 sm:$0xff]  }
   0x8   :  { %291 = vmatprep.subr.bf16.mxu0 %v564_v4  ;;  %250 = vmatprep.subr.bf16.mxu1 %v564_v4  ;;  %v53_v20 = vrot.slane %v45_v19, %v609_v16  ;;  %v679_v35 = vld [vmem:[%s767_s1 + $0x90] ss:$8 sps:$4 sm:$0xff]   ;;  %v686_v36 = vld [vmem:[%s767_s1 + $0xa4] ss:$8 sps:$4 sm:$0xff]   ;;  %v694_v40 = vld [vmem:[%s767_s1 + $0xa0] ss:$8 sps:$4 sm:$0xff]  }
   0x9   :  { %v701_v41 = vld [vmem:[%s767_s1 + $0xb4] ss:$8 sps:$4 sm:$0xff]   ;;  %v498_v45 = vld [vmem:[%s767_s1 + $0xb0] ss:$8 sps:$4 sm:$0xff]   ;;  %v499_v46 = vld [vmem:[%s767_s1 + $0xc4] ss:$8 sps:$4 sm:$0xff]  }
   0xa   :  { %v54_v23 = vcombine.high %v53_v20, %v53_v20  ;;  %v642_v24 = vpack.c.bf16 %v53_v20, %v53_v20  ;;  %v501_v48 = vld [vmem:[%s767_s1 + $0xc0] ss:$8 sps:$4 sm:$0xff]   ;;  %v502_v50 = vld [vmem:[%s767_s1 + $0xd4] ss:$8 sps:$4 sm:$0xff]   ;;  %v504_v51 = vld [vmem:[%s767_s1 + $0xd0] ss:$8 sps:$4 sm:$0xff]  }
   0xb   :  { %292 = vmatpush1.bf16.msra.mxu0 %v571_v5  ;;  %251 = vmatpush1.bf16.msra.mxu1 %v571_v5  ;;  %v505_v53 = vld [vmem:[%s767_s1 + $0xe4] ss:$8 sps:$4 sm:$0xff]   ;;  %v507_v54 = vld [vmem:[%s767_s1 + $0xe0] ss:$8 sps:$4 sm:$0xff]   ;;  %v508_v56 = vld [vmem:[%s767_s1 + $0xf4] ss:$8 sps:$4 sm:$0xff]  }
   0xc   :  { %293 = vmatprep.subr.bf16.mxu0 %v578_v6  ;;  %252 = vmatprep.subr.bf16.mxu1 %v578_v6  ;;  %v58_v25 = vpack.c.bf16 %v54_v23, %v54_v23  ;;  %v59_v26 = vunpack.c.l.bf16 %v642_v24  ;;  %v510_v57 = vld [vmem:[%s767_s1 + $0xf0] ss:$8 sps:$4 sm:$0xff]  }
   0xe   :  { %v60_v29 = vunpack.c.l.bf16 %v58_v25  ;;  %319 = vmatprep.mubr.bf16.mxu0 %v58_v25 }
   0xf   :  { %294 = vmatpush1.bf16.msra.mxu0 %v585_v10  ;;  %253 = vmatpush1.bf16.msra.mxu1 %v585_v10 }
  0x10   :  { %295 = vmatprep.subr.bf16.mxu0 %v592_v11  ;;  %254 = vmatprep.subr.bf16.mxu1 %v592_v11  ;;  %v63_v30 = vcombine.low %v59_v26, %v60_v29 }
  0x12   :  { %v70_v33 = vrot.slane %v63_v30, %v609_v16 }
  0x13   :  { %296 = vmatpush1.bf16.msra.mxu0 %v599_v14  ;;  %255 = vmatpush1.bf16.msra.mxu1 %v599_v14 }
  0x14   :  { %297 = vmatprep.subr.bf16.mxu0 %v606_v15  ;;  %256 = vmatprep.subr.bf16.mxu1 %v606_v15  ;;  %v72_v34 = vsub.f32 %v45_v19, %v70_v33 }
  0x16   :  { %v80_v37 = vrot.slane %v72_v34, %v609_v16 }
  0x17   :  { %298 = vmatpush1.bf16.msra.mxu0 %v615_v17  ;;  %257 = vmatpush1.bf16.msra.mxu1 %v615_v17 }
  0x18   :  { %299 = vmatprep.subr.bf16.mxu0 %v622_v18  ;;  %258 = vmatprep.subr.bf16.mxu1 %v622_v18  ;;  %v81_v38 = vcombine.high %v80_v37, %v80_v37  ;;  %v84_v39 = vpack.c.bf16 %v80_v37, %v80_v37 }
  0x1a   :  { %v85_v42 = vpack.c.bf16 %v81_v38, %v81_v38  ;;  %v328_v43 = vunpack.c.l.bf16 %v84_v39 }
  0x1b   :  { %300 = vmatpush1.bf16.msra.mxu0 %v633_v21  ;;  %259 = vmatpush1.bf16.msra.mxu1 %v633_v21 }
  0x1c   :  { %301 = vmatprep.subr.bf16.mxu0 %v640_v22  ;;  %260 = vmatprep.subr.bf16.mxu1 %v640_v22  ;;  %v329_v44 = vunpack.c.l.bf16 %v85_v42 }
  0x1d   :  { %278 = vmatprep.mubr.bf16.mxu1 %v85_v42 }
  0x1e   :  { %v332_v47 = vcombine.low %v328_v43, %v329_v44 }
  0x1f   :  { %302 = vmatpush1.bf16.msra.mxu0 %v650_v27  ;;  %261 = vmatpush1.bf16.msra.mxu1 %v650_v27 }
  0x20   :  { %303 = vmatprep.subr.bf16.mxu0 %v657_v28  ;;  %262 = vmatprep.subr.bf16.mxu1 %v657_v28  ;;  %v339_v49 = vrot.slane %v332_v47, %v609_v16 }
  0x22   :  { %v341_v52 = vsub.f32 %v72_v34, %v339_v49 }
  0x23   :  { %304 = vmatpush1.bf16.msra.mxu0 %v664_v31  ;;  %263 = vmatpush1.bf16.msra.mxu1 %v664_v31 }
  0x24   :  { %305 = vmatprep.subr.bf16.mxu0 %v671_v32  ;;  %264 = vmatprep.subr.bf16.mxu1 %v671_v32  ;;  %v349_v55 = vrot.slane %v341_v52, %v609_v16 }
  0x26   :  { %v350_v58 = vcombine.high %v349_v55, %v349_v55  ;;  %v353_v60 = vpack.c.bf16 %v349_v55, %v349_v55 }
  0x27   :  { %306 = vmatpush1.bf16.msra.mxu0 %v679_v35  ;;  %265 = vmatpush1.bf16.msra.mxu1 %v679_v35 }
  0x28   :  { %307 = vmatprep.subr.bf16.mxu0 %v686_v36  ;;  %266 = vmatprep.subr.bf16.mxu1 %v686_v36  ;;  %v354_v59 = vpack.c.bf16 %v350_v58, %v350_v58 }
  0x2b   :  { %308 = vmatpush1.bf16.msra.mxu0 %v694_v40  ;;  %267 = vmatpush1.bf16.msra.mxu1 %v694_v40 }
  0x2c   :  { %309 = vmatprep.subr.bf16.mxu0 %v701_v41  ;;  %268 = vmatprep.subr.bf16.mxu1 %v701_v41 }
  0x2f   :  { %310 = vmatpush1.bf16.msra.mxu0 %v498_v45  ;;  %269 = vmatpush1.bf16.msra.mxu1 %v498_v45 }
  0x30   :  { %311 = vmatprep.subr.bf16.mxu0 %v499_v46  ;;  %270 = vmatprep.subr.bf16.mxu1 %v499_v46 }
  0x33   :  { %312 = vmatpush1.bf16.msra.mxu0 %v501_v48  ;;  %271 = vmatpush1.bf16.msra.mxu1 %v501_v48 }
  0x34   :  { %313 = vmatprep.subr.bf16.mxu0 %v502_v50  ;;  %272 = vmatprep.subr.bf16.mxu1 %v502_v50 }
  0x37   :  { %314 = vmatpush1.bf16.msra.mxu0 %v504_v51  ;;  %273 = vmatpush1.bf16.msra.mxu1 %v504_v51 }
  0x38   :  { %315 = vmatprep.subr.bf16.mxu0 %v505_v53  ;;  %274 = vmatprep.subr.bf16.mxu1 %v505_v53 }
  0x3b   :  { %316 = vmatpush1.bf16.msra.mxu0 %v507_v54  ;;  %275 = vmatpush1.bf16.msra.mxu1 %v507_v54 }
  0x3c   :  { %317 = vmatprep.subr.bf16.mxu0 %v508_v56  ;;  %276 = vmatprep.subr.bf16.mxu1 %v508_v56 }
  0x3f   :  { %318 = vmatpush1.bf16.msra.mxu0 %v510_v57  ;;  %277 = vmatpush1.bf16.msra.mxu1 %v510_v57 }
  0x40   :  { %355 = vmatprep.subr.bf16.mxu0 %v539_v0 }
  0x42   :  { %320 = vmatmul.mubr.bf16.vlgmr.msra.gmra.mrb[0].mxu0 %v642_v24  ;;  %279 = vmatmul.mubr.bf16.vlgmr.msra.gmra.mrb[0].mxu1 %v84_v39 }
  0x43   :  { %356 = vmatpush1.bf16.msra.mxu0 %v544_v1  ;;  %387 = vmatprep.mubr.bf16.mxu0 %v354_v59 }
  0x44   :  { %357 = vmatprep.subr.bf16.mxu0 %v550_v2 }
  0x47   :  { %358 = vmatpush1.bf16.msra.mxu0 %v557_v3 }
  0x48   :  { %359 = vmatprep.subr.bf16.mxu0 %v564_v4 }
  0x4b   :  { %360 = vmatpush1.bf16.msra.mxu0 %v571_v5 }
  0x4c   :  { %361 = vmatprep.subr.bf16.mxu0 %v578_v6 }
  0x4f   :  { %362 = vmatpush1.bf16.msra.mxu0 %v585_v10 }
  0x50   :  { %363 = vmatprep.subr.bf16.mxu0 %v592_v11 }
  0x53   :  { %364 = vmatpush1.bf16.msra.mxu0 %v599_v14 }
  0x54   :  { %365 = vmatprep.subr.bf16.mxu0 %v606_v15 }
  0x57   :  { %366 = vmatpush1.bf16.msra.mxu0 %v615_v17 }
  0x58   :  { %367 = vmatprep.subr.bf16.mxu0 %v622_v18 }
  0x5b   :  { %368 = vmatpush1.bf16.msra.mxu0 %v633_v21 }
  0x5c   :  { %369 = vmatprep.subr.bf16.mxu0 %v640_v22 }
  0x5f   :  { %370 = vmatpush1.bf16.msra.mxu0 %v650_v27 }
  0x60   :  { %371 = vmatprep.subr.bf16.mxu0 %v657_v28 }
  0x63   :  { %372 = vmatpush1.bf16.msra.mxu0 %v664_v31 }
  0x64   :  { %373 = vmatprep.subr.bf16.mxu0 %v671_v32 }
  0x67   :  { %374 = vmatpush1.bf16.msra.mxu0 %v679_v35 }
  0x68   :  { %375 = vmatprep.subr.bf16.mxu0 %v686_v36 }
  0x6b   :  { %376 = vmatpush1.bf16.msra.mxu0 %v694_v40 }
  0x6c   :  { %377 = vmatprep.subr.bf16.mxu0 %v701_v41 }
  0x6f   :  { %378 = vmatpush1.bf16.msra.mxu0 %v498_v45 }
  0x70   :  { %379 = vmatprep.subr.bf16.mxu0 %v499_v46 }
  0x73   :  { %380 = vmatpush1.bf16.msra.mxu0 %v501_v48 }
  0x74   :  { %381 = vmatprep.subr.bf16.mxu0 %v502_v50 }
  0x77   :  { %382 = vmatpush1.bf16.msra.mxu0 %v504_v51 }
  0x78   :  { %383 = vmatprep.subr.bf16.mxu0 %v505_v53 }
  0x7b   :  { %384 = vmatpush1.bf16.msra.mxu0 %v507_v54 }
  0x7c   :  { %385 = vmatprep.subr.bf16.mxu0 %v508_v56 }
  0x7f   :  { %386 = vmatpush1.bf16.msra.mxu0 %v510_v57 }
  0x82   :  { %388 = vmatmul.mubr.bf16.vlgmr.msra.gmra.mrb[0].mxu0 %v353_v60 }
 0x115   :  { %v280_v61 = vpop.f32.mrb[0].mxu1 }
 0x116   :  { %v282_v62 = vpop.f32.mrb[1].mxu1 }
 0x117   :  { %v284_v63 = vpop.f32.mrb[2].mxu1 }
 0x118   :  { %v285_v0 = vpop.f32.mrb[3].mxu1 }
 0x155   :  { %v389_v1 = vpop.f32.mrb[0].mxu0 }
 0x156   :  { %v456_v2 = vadd.f32 %v389_v1, %v280_v61  ;;  %v391_v3 = vpop.f32.mrb[1].mxu0 }
 0x157   :  { %v457_v4 = vadd.f32 %v391_v3, %v282_v62  ;;  %v393_v5 = vpop.f32.mrb[2].mxu0 }
 0x158   :  { %414 = vst [vmem:[%s769_s2] sm:$0x3] %v456_v2  ;;  %v394_v6 = vpop.f32.mrb[3].mxu0 }
 0x159   :  { %v399_v7 = vand.u32 2147483647, %v457_v4  ;;  %v398_v18 = vmax.f32 %v457_v4, 0.0 }
 0x15b   :  { %v400_v8 = vsub.f32 0.0, %v399_v7 }
 0x15d   :  { %v401_v9 = vmul.f32 1.442695, %v400_v8 }
 0x15f   :  { %511 = vpow2.f32 %v401_v9 }
 0x169   :  { %v512_v10 = vpop.eup %511 }
 0x16a   :  { %v403_v11 = vadd.f32 1.0, %v512_v10  ;;  %v406_v12 = vmul.f32 -0.5, %v512_v10  ;;  %v409_v14 = vand.u32 2147483647, %v512_v10 }
 0x16c   :  { %513 = vlog2.f32 %v403_v11  ;;  %v407_v13 = vadd.f32 1.0, %v406_v12  ;;  %vm410_vm0 = vcmp.lt.f32.partialorder %v409_v14, 0.0004427343 }
 0x16e   :  { %v408_v17 = vmul.f32 %v512_v10, %v407_v13 }
 0x176   :  { %v514_v15 = vpop.eup %513 }
 0x177   :  { %v405_v16 = vmul.f32 0.6931472, %v514_v15 }
 0x179   :  { %v411_v19 = vsel %vm410_vm0, %v408_v17, %v405_v16 }
 0x17a   :  { %v412_v20 = vadd.f32 %v411_v19, %v398_v18 }
 0x17c   :  { %v413_v21 = vadd.f32 0.001, %v412_v20 }
 0x17e   :  { %415 = vst [vmem:[%s770_s3] sm:$0x3] %v413_v21 }

</bundles_post_ra>
